<compile_context>
chip_gen: v5e
topology: v5e:2x2
jax: 0.10.0
libtpu: 0.0.40
codegen_flags: <defaults>
</compile_context>

<pallas_src>
import functools

import jax
import jax.numpy as jnp
from jax import lax
from jax.experimental import pallas as pl
from jax.experimental.pallas import tpu as pltpu


def _cdiv(a, b):
    return -(-a // b)


def _nconv_kernel(a_ref, x_ref, o_ref, xr_ref, *, tc, seq_l, compute_dtype):
    """One (batch-block, channel-block) grid step.

    a_ref : (BN, W, V)       A, natural layout (VMEM-resident across the
                             channel-block axis).
    x_ref : (BN, TC, V, L)   x, natural layout (HBM side of the DMA contiguous).
    o_ref : (BN, TC, W, L)   out, natural layout (no wrapper transpose needed).
    xr_ref: (BN, V, TC*L)    VMEM scratch: lane-dense relaid-out x block.
    """
    L = seq_l

    # In-VMEM relayout: (BN, TC, V, L) -> (BN, V, TC*L).  Per-channel lane-slice
    # stores; the shifts/masks run on otherwise idle XLU/VPU slots.  This
    # replaces the wrapper-side HBM transpose of the previous version.
    for c in range(tc):
        xr_ref[:, :, c * L:(c + 1) * L] = x_ref[:, c, :, :].astype(xr_ref.dtype)

    # Lane-dense batched MXU matmul, f32 accumulation:
    #   (BN, W, V) x (BN, V, TC*L) -> (BN, W, TC*L)
    res = lax.dot_general(
        a_ref[...].astype(compute_dtype),
        xr_ref[...],
        dimension_numbers=(((2,), (1,)), ((0,), (0,))),
        preferred_element_type=jnp.float32,
    )

    # In-VMEM relayout back: (BN, W, TC*L) -> (BN, TC, W, L), stored directly
    # in the natural output layout (kills the wrapper-side output transpose).
    for c in range(tc):
        o_ref[:, c, :, :] = res[:, :, c * L:(c + 1) * L].astype(o_ref.dtype)


def _vmem_capacity_bytes():
    try:
        cap = getattr(pltpu.get_tpu_info(), "vmem_capacity_bytes", None)
        if cap:
            return int(cap)
    except Exception:
        pass
    return 64 * 1024 * 1024  # conservative (v7x-sized) fallback


def _choose_blocks(N, C, V, W, L, x_isz, a_isz, cdt_isz, out_isz, budget):
    """Pick (BN batch block, TC channel block) with honest VMEM accounting."""

    def lanes(n):
        return _cdiv(n, 128) * 128

    def subs(n):
        return _cdiv(n, 8) * 8

    def tile_bytes(bn, tc):
        m = tc * L
        x_blk = bn * tc * subs(V) * lanes(L) * x_isz       # natural x block (lane-padded)
        a_blk = bn * subs(W) * lanes(V) * a_isz            # natural A block
        o_blk = bn * tc * subs(W) * lanes(L) * out_isz     # natural out block (OUT dtype)
        xr = bn * subs(V) * lanes(m) * cdt_isz             # relayout scratch
        a_cast = bn * subs(W) * lanes(V) * cdt_isz         # casted A operand
        res = bn * subs(W) * lanes(m) * 4                  # f32 dot_general result
        # Pallas double-buffers every BlockSpec'd operand; scratch/temps are single.
        return 2 * (x_blk + a_blk + o_blk) + xr + a_cast + res

    def steps(bn, tc):
        return _cdiv(N, bn) * _cdiv(C, tc)

    # 1) Largest channel block that fits the budget with a single batch element.
    tc = C
    while tc > 1 and tile_bytes(1, tc) > budget:
        tc = _cdiv(tc, 2)

    # 2) Never leave the grid at a single step when splittable: v7x has 2
    #    TensorCores and a 1-step grid also defeats pipelining.
    while steps(1, tc) < 2 and tc > 1:
        tc = _cdiv(tc, 2)
    # Prefer >=4 steps if that still keeps the matmul lane-dense (>=256 lanes).
    if steps(1, tc) < 4 and tc > 1 and _cdiv(tc, 2) * L >= 256:
        tc = _cdiv(tc, 2)

    # 3) Pack batch elements per step (amortizes the ~0.35us/step overhead) as
    #    long as the block fits and the grid keeps >=4 steps for overlap and
    #    for both v7x TensorCores.
    bn = 1
    while (2 * bn <= N and tile_bytes(2 * bn, tc) <= budget
           and steps(2 * bn, tc) >= 4):
        bn *= 2

    return bn, tc, tile_bytes(bn, tc)


def nconv(x, A, *, compute_dtype=jnp.bfloat16, out_dtype=None):
    """Pallas TPU implementation of einsum('ncvl,nwv->ncwl', x, A).

    compute_dtype: dtype fed to the MXU (cast happens inside the kernel, so it
        never adds an HBM pass; accumulation is always f32).  Pass None to
        multiply exactly in the input dtype.
    out_dtype: output dtype (default x.dtype, matching the PyTorch module).
    """
    N, C, V, L = x.shape
    Na, W, Va = A.shape
    assert Na == N and Va == V, "shape mismatch between x and A"

    out_dtype = jnp.dtype(x.dtype if out_dtype is None else out_dtype)
    cdt = jnp.dtype(x.dtype if compute_dtype is None else compute_dtype)

    # Generation-aware VMEM budgets (the honest per-block accounting is in
    # _choose_blocks, including the f32 dot result and the out-dtype block).
    cap = _vmem_capacity_bytes()
    if cap >= 96 * 1024 * 1024:          # v5e / v6e: 128 MiB physical VMEM
        budget, vmem_limit = 40 << 20, 96 << 20
    else:                                 # v7x: 64 MiB physical VMEM
        budget, vmem_limit = 30 << 20, 48 << 20

    BN, TC, need = _choose_blocks(
        N, C, V, W, L,
        jnp.dtype(x.dtype).itemsize, jnp.dtype(A.dtype).itemsize,
        cdt.itemsize, out_dtype.itemsize, budget)
    # The minimum block may exceed the nominal budget for extreme shapes;
    # raise the limit (with headroom, never past ~90% of physical VMEM).
    vmem_limit = min(int(cap * 0.9), max(vmem_limit, need + (8 << 20)))

    # NOTE(do not reorder): the channel-block axis MUST remain the last
    # (fastest) grid axis and A's index_map must ignore it — that is what
    # keeps A VMEM-resident across channel blocks instead of re-DMAing it
    # (W*V*itemsize of extra HBM traffic) on every grid step.
    grid = (_cdiv(N, BN), _cdiv(C, TC))

    kernel = functools.partial(_nconv_kernel, tc=TC, seq_l=L, compute_dtype=cdt)

    cost = pl.CostEstimate(
        flops=2 * N * C * W * V * L,
        bytes_accessed=(int(x.size) * jnp.dtype(x.dtype).itemsize
                        + int(A.size) * jnp.dtype(A.dtype).itemsize
                        + N * C * W * L * out_dtype.itemsize),
        transcendentals=0,
    )

    return pl.pallas_call(
        kernel,
        out_shape=jax.ShapeDtypeStruct((N, C, W, L), out_dtype),
        grid=grid,
        in_specs=[
            # A: resident across the channel axis (index_map ignores `c`).
            pl.BlockSpec((BN, W, V), lambda b, c: (b, 0, 0)),
            # x: natural (N, C, V, L) blocks — HBM side of the DMA contiguous.
            pl.BlockSpec((BN, TC, V, L), lambda b, c: (b, c, 0, 0)),
        ],
        # out: written directly in its natural (N, C, W, L) layout.
        out_specs=pl.BlockSpec((BN, TC, W, L), lambda b, c: (b, c, 0, 0)),
        scratch_shapes=[pltpu.VMEM((BN, V, TC * L), cdt)],
        compiler_params=pltpu.CompilerParams(
            dimension_semantics=("parallel", "parallel"),
            vmem_limit_bytes=int(vmem_limit),
        ),
        cost_estimate=cost,
    )(A, x)


if __name__ == "__main__":
    # Small deterministic inputs consistent with the module's forward.
    N, C, V, L = 2, 4, 16, 8   # batch, channels, nodes, seq
    W = 16                     # output node dimension of A

    key = jax.random.PRNGKey(0)
    kx, ka = jax.random.split(key)
    x = jax.random.normal(kx, (N, C, V, L), dtype=jnp.float32)
    A = jax.random.normal(ka, (N, W, V), dtype=jnp.float32)

    # Reference (plain JAX einsum, mirrors the PyTorch semantics).
    ref = jnp.einsum("ncvl,nwv->ncwl", x, A)

    # Exact path (compute in the input dtype) -- tight tolerance.
    out_f32 = jax.block_until_ready(nconv(x, A, compute_dtype=None))
    assert out_f32.shape == (N, C, W, L), out_f32.shape
    assert out_f32.dtype == x.dtype, out_f32.dtype
    assert jnp.allclose(out_f32, ref, atol=1e-5, rtol=1e-5), "mismatch vs reference (f32)"

    # Default path (bf16 MXU operands, f32 accumulation) -- relaxed tolerance.
    out = jax.block_until_ready(nconv(x, A))
    assert out.shape == (N, C, W, L), out.shape
    assert out.dtype == x.dtype, out.dtype
    assert jnp.allclose(out, ref, atol=2e-1, rtol=5e-2), "mismatch vs reference (bf16)"

    print("KERNEL_OK")
</pallas_src>

<mosaic_0001>
module attributes {stable_mosaic.version = 11 : i64} {
  func.func @_nconv_kernel(%arg0: i32, %arg1: i32, %arg2: memref<1x16x16xf32, #tpu.memory_space<vmem>>, %arg3: memref<1x4x16x8xf32, #tpu.memory_space<vmem>>, %arg4: memref<1x4x16x8xf32, #tpu.memory_space<vmem>>, %arg5: memref<1x16x32xf32, #tpu.memory_space<vmem>>) attributes {dimension_semantics = [#tpu.dimension_semantics<parallel>, #tpu.dimension_semantics<parallel>], iteration_bounds = array<i64: 2, 1>, scalar_prefetch = 0 : i64, scratch_operands = 1 : i64, tpu.core_type = #tpu.core_type<tc>, window_params = [{transform_indices = @transform_0, window_bounds = array<i64: 1, 16, 16>}, {transform_indices = @transform_1, window_bounds = array<i64: 1, 4, 16, 8>}, {transform_indices = @transform_2, window_bounds = array<i64: 1, 4, 16, 8>}]} {
    %c0 = arith.constant 0 : index
    %c0_0 = arith.constant 0 : index
    %c0_1 = arith.constant 0 : index
    %c0_2 = arith.constant 0 : index
    %0 = vector.load %arg3[%c0, %c0_0, %c0_1, %c0_2] : memref<1x4x16x8xf32, #tpu.memory_space<vmem>>, vector<1x1x16x8xf32>
    %1 = vector.shape_cast %0 : vector<1x1x16x8xf32> to vector<1x16x8xf32>
    %c0_3 = arith.constant 0 : index
    %c0_4 = arith.constant 0 : index
    %c0_5 = arith.constant 0 : index
    %2 = vector.load %arg5[%c0_3, %c0_4, %c0_5] : memref<1x16x32xf32, #tpu.memory_space<vmem>>, vector<1x16x8xf32>
    tpu.vector_store %arg5[%c0_3, %c0_4, %c0_5], %1 {strides = array<i32>} : memref<1x16x32xf32, #tpu.memory_space<vmem>>, vector<1x16x8xf32>,
    %c0_6 = arith.constant 0 : index
    %c1 = arith.constant 1 : index
    %c0_7 = arith.constant 0 : index
    %c0_8 = arith.constant 0 : index
    %3 = vector.load %arg3[%c0_6, %c1, %c0_7, %c0_8] : memref<1x4x16x8xf32, #tpu.memory_space<vmem>>, vector<1x1x16x8xf32>
    %4 = vector.shape_cast %3 : vector<1x1x16x8xf32> to vector<1x16x8xf32>
    %c0_9 = arith.constant 0 : index
    %c0_10 = arith.constant 0 : index
    %c8 = arith.constant 8 : index
    %5 = vector.load %arg5[%c0_9, %c0_10, %c8] : memref<1x16x32xf32, #tpu.memory_space<vmem>>, vector<1x16x8xf32>
    tpu.vector_store %arg5[%c0_9, %c0_10, %c8], %4 {strides = array<i32>} : memref<1x16x32xf32, #tpu.memory_space<vmem>>, vector<1x16x8xf32>,
    %c0_11 = arith.constant 0 : index
    %c2 = arith.constant 2 : index
    %c0_12 = arith.constant 0 : index
    %c0_13 = arith.constant 0 : index
    %6 = vector.load %arg3[%c0_11, %c2, %c0_12, %c0_13] : memref<1x4x16x8xf32, #tpu.memory_space<vmem>>, vector<1x1x16x8xf32>
    %7 = vector.shape_cast %6 : vector<1x1x16x8xf32> to vector<1x16x8xf32>
    %c0_14 = arith.constant 0 : index
    %c0_15 = arith.constant 0 : index
    %c16 = arith.constant 16 : index
    %8 = vector.load %arg5[%c0_14, %c0_15, %c16] : memref<1x16x32xf32, #tpu.memory_space<vmem>>, vector<1x16x8xf32>
    tpu.vector_store %arg5[%c0_14, %c0_15, %c16], %7 {strides = array<i32>} : memref<1x16x32xf32, #tpu.memory_space<vmem>>, vector<1x16x8xf32>,
    %c0_16 = arith.constant 0 : index
    %c3 = arith.constant 3 : index
    %c0_17 = arith.constant 0 : index
    %c0_18 = arith.constant 0 : index
    %9 = vector.load %arg3[%c0_16, %c3, %c0_17, %c0_18] : memref<1x4x16x8xf32, #tpu.memory_space<vmem>>, vector<1x1x16x8xf32>
    %10 = vector.shape_cast %9 : vector<1x1x16x8xf32> to vector<1x16x8xf32>
    %c0_19 = arith.constant 0 : index
    %c0_20 = arith.constant 0 : index
    %c24 = arith.constant 24 : index
    %11 = vector.load %arg5[%c0_19, %c0_20, %c24] : memref<1x16x32xf32, #tpu.memory_space<vmem>>, vector<1x16x8xf32>
    tpu.vector_store %arg5[%c0_19, %c0_20, %c24], %10 {strides = array<i32>} : memref<1x16x32xf32, #tpu.memory_space<vmem>>, vector<1x16x8xf32>,
    %c0_21 = arith.constant 0 : index
    %c0_22 = arith.constant 0 : index
    %c0_23 = arith.constant 0 : index
    %12 = vector.load %arg2[%c0_21, %c0_22, %c0_23] : memref<1x16x16xf32, #tpu.memory_space<vmem>>, vector<1x16x16xf32>
    %c0_24 = arith.constant 0 : index
    %c0_25 = arith.constant 0 : index
    %c0_26 = arith.constant 0 : index
    %13 = vector.load %arg5[%c0_24, %c0_25, %c0_26] : memref<1x16x32xf32, #tpu.memory_space<vmem>>, vector<1x16x32xf32>
    %cst = arith.constant dense<0.000000e+00> : vector<1x16x32xf32>
    %14 = tpu.matmul %12, %13, %cst {dimension_numbers = #tpu.dot_dimension_numbers<[2], [1], [1], [2], [0, 0, 0, 1, 1, 2], [0], [0]>} : vector<1x16x16xf32>, vector<1x16x32xf32>, vector<1x16x32xf32> -> vector<1x16x32xf32>
    %15 = vector.extract_strided_slice %14 {offsets = [0, 0, 0], sizes = [1, 16, 8], strides = [1, 1, 1]} : vector<1x16x32xf32> to vector<1x16x8xf32>
    %c0_27 = arith.constant 0 : index
    %c0_28 = arith.constant 0 : index
    %c0_29 = arith.constant 0 : index
    %c0_30 = arith.constant 0 : index
    %16 = vector.load %arg4[%c0_27, %c0_28, %c0_29, %c0_30] : memref<1x4x16x8xf32, #tpu.memory_space<vmem>>, vector<1x1x16x8xf32>
    %17 = vector.shape_cast %16 : vector<1x1x16x8xf32> to vector<1x16x8xf32>
    %18 = vector.shape_cast %15 : vector<1x16x8xf32> to vector<1x1x16x8xf32>
    tpu.vector_store %arg4[%c0_27, %c0_28, %c0_29, %c0_30], %18 {strides = array<i32>} : memref<1x4x16x8xf32, #tpu.memory_space<vmem>>, vector<1x1x16x8xf32>,
    %19 = vector.extract_strided_slice %14 {offsets = [0, 0, 8], sizes = [1, 16, 8], strides = [1, 1, 1]} : vector<1x16x32xf32> to vector<1x16x8xf32>
    %c0_31 = arith.constant 0 : index
    %c1_32 = arith.constant 1 : index
    %c0_33 = arith.constant 0 : index
    %c0_34 = arith.constant 0 : index
    %20 = vector.load %arg4[%c0_31, %c1_32, %c0_33, %c0_34] : memref<1x4x16x8xf32, #tpu.memory_space<vmem>>, vector<1x1x16x8xf32>
    %21 = vector.shape_cast %20 : vector<1x1x16x8xf32> to vector<1x16x8xf32>
    %22 = vector.shape_cast %19 : vector<1x16x8xf32> to vector<1x1x16x8xf32>
    tpu.vector_store %arg4[%c0_31, %c1_32, %c0_33, %c0_34], %22 {strides = array<i32>} : memref<1x4x16x8xf32, #tpu.memory_space<vmem>>, vector<1x1x16x8xf32>,
    %23 = vector.extract_strided_slice %14 {offsets = [0, 0, 16], sizes = [1, 16, 8], strides = [1, 1, 1]} : vector<1x16x32xf32> to vector<1x16x8xf32>
    %c0_35 = arith.constant 0 : index
    %c2_36 = arith.constant 2 : index
    %c0_37 = arith.constant 0 : index
    %c0_38 = arith.constant 0 : index
    %24 = vector.load %arg4[%c0_35, %c2_36, %c0_37, %c0_38] : memref<1x4x16x8xf32, #tpu.memory_space<vmem>>, vector<1x1x16x8xf32>
    %25 = vector.shape_cast %24 : vector<1x1x16x8xf32> to vector<1x16x8xf32>
    %26 = vector.shape_cast %23 : vector<1x16x8xf32> to vector<1x1x16x8xf32>
    tpu.vector_store %arg4[%c0_35, %c2_36, %c0_37, %c0_38], %26 {strides = array<i32>} : memref<1x4x16x8xf32, #tpu.memory_space<vmem>>, vector<1x1x16x8xf32>,
    %27 = vector.extract_strided_slice %14 {offsets = [0, 0, 24], sizes = [1, 16, 8], strides = [1, 1, 1]} : vector<1x16x32xf32> to vector<1x16x8xf32>
    %c0_39 = arith.constant 0 : index
    %c3_40 = arith.constant 3 : index
    %c0_41 = arith.constant 0 : index
    %c0_42 = arith.constant 0 : index
    %28 = vector.load %arg4[%c0_39, %c3_40, %c0_41, %c0_42] : memref<1x4x16x8xf32, #tpu.memory_space<vmem>>, vector<1x1x16x8xf32>
    %29 = vector.shape_cast %28 : vector<1x1x16x8xf32> to vector<1x16x8xf32>
    %30 = vector.shape_cast %27 : vector<1x16x8xf32> to vector<1x1x16x8xf32>
    tpu.vector_store %arg4[%c0_39, %c3_40, %c0_41, %c0_42], %30 {strides = array<i32>} : memref<1x4x16x8xf32, #tpu.memory_space<vmem>>, vector<1x1x16x8xf32>,
    return
  }
  func.func @transform_0(%arg0: i32, %arg1: i32) -> (i32, i32, i32) {
    %c0_i32 = arith.constant 0 : i32
    %c0_i32_0 = arith.constant 0 : i32
    %c0_i32_1 = arith.constant 0 : i32
    return %arg0, %c0_i32, %c0_i32_0 : i32, i32, i32
  }
  func.func @transform_1(%arg0: i32, %arg1: i32) -> (i32, i32, i32, i32) {
    %c0_i32 = arith.constant 0 : i32
    %c0_i32_0 = arith.constant 0 : i32
    %c0_i32_1 = arith.constant 0 : i32
    return %arg0, %arg1, %c0_i32, %c0_i32_0 : i32, i32, i32, i32
  }
  func.func @transform_2(%arg0: i32, %arg1: i32) -> (i32, i32, i32, i32) {
    %c0_i32 = arith.constant 0 : i32
    %c0_i32_0 = arith.constant 0 : i32
    %c0_i32_1 = arith.constant 0 : i32
    return %arg0, %arg1, %c0_i32, %c0_i32_0 : i32, i32, i32, i32
  }
}

</mosaic_0001>

<bundles_post_ra>
// kernel: tpu_custom_call.1
= control target key start
LH: loop header
LB: loop body
LE: loop exit
PB: predicated region body
PF: predicated region fallthrough
CT: control target
= control target key end

     0   :  { %s535_s9 = smov 0   ;;  %s537_s10 = smov 0   ;;  %s589_s0 = inlined_call_operand.vmem [shape: f32[2,16,16], index: 0, kind: input, shape index: {}]   ;;  %s590_s1 = inlined_call_operand.vmem [shape: f32[2,4,16,8], index: 1, kind: input, shape index: {}]   ;;  %s591_s2 = inlined_call_operand.vmem [shape: f32[2,4,16,8], index: 2, kind: output, shape index: {}]  }
   0x1   :  { %s539_s11 = smov 0  }
   0x2 LB: > { %s24_s12 = sadd.s32 1, %s508_s10  ;;  %p432_p0 = scmp.ge.s32.totalorder %s512_s11, 1  ;;  %s512_s11 = sphi %s539_s11, %s12_s11   ;;  %s508_s10 = sphi %s537_s10, %s593_s10   ;;  %s504_s9 = sphi %s535_s9, %s592_s9  }
   0x3   : > { %p26_p1 = scmp.ge.s32.totalorder %s24_s12, 2  ;;  %p144_p2 = scmp.lt.s32.totalorder %s512_s11, 3 }
   0x5   : > { %s595_s12 = smov (%p26_p1, %s24_s12), 0  ;;  %p145_p3 = pnand %p432_p0, %p144_p2 }
   0x6   : > { %p181_p4 = scmp.lt.s32.totalorder (!%p145_p3), %s504_s9, 1  ;;  %s514_s17 = smov (!%p145_p3), 8  }
   0x7   : > { %148 = sbr.rel (%p145_p3) target bundleno = 402 (0x192), region = 28  ;;  %s515_s18 = smov (!%p145_p3), 16  }
   0x8   : > { %s516_s19 = smov (!%p145_p3), 24   ;;  %s517_s27 = smov (!%p145_p3), 120  }
   0x9   : > { %s518_s28 = smov (!%p145_p3), 112   ;;  %s519_s29 = smov (!%p145_p3), 104  }
   0xc   : > { %s597_s9 = smov (!%p181_p4, %s504_s9), 1  ;;  %vm210_vm0 = vcmask 64512   ;;  %vm224_vm1 = vcmask 130112   ;;  %vm238_vm2 = vcmask 195712   ;;  %vm252_vm3 = vcmask 261312  }
   0xd   : > { %s456_s13 = sshll.u32 %s597_s9, 6  ;;  %s455_s20 = sshll.u32 %s597_s9, 4  ;;  %vm259_vm4 = vcmask 130048  }
   0xe   : > { %s195_s16 = scalar_lea.vmem %s590_s1, %s456_s13  ;;  %s185_s23 = scalar_lea.vmem %s589_s0, %s455_s20 }
   0xf   : > { %v440_v0 = vld [vmem:[%s195_s16 + $0x18] sm:$0xff]  ;;  %v439_v1 = vld [vmem:[%s195_s16 + $0x10] sm:$0xff]  ;;  %v441_v2 = vld [vmem:[%s195_s16 + $0x20] sm:$0xff]  ;;  %s206_s26 = scalar_lea.vmem %s591_s2, %s456_s13 }
  0x10   : > { %220 = vrot.lane.b32.xlu0 %v440_v0, %s514_s17  ;;  %218 = vrot.lane.b32.xlu1 %v439_v1, %s514_s17  ;;  %v442_v3 = vld [vmem:[%s195_s16 + $0x28] sm:$0xff]  ;;  %v444_v4 = vld [vmem:[%s195_s16 + $0x38] sm:$0xff] }
  0x11   : > { %232 = vrot.lane.b32.xlu2 %v441_v2, %s515_s18  ;;  %v443_v5 = vld [vmem:[%s195_s16 + $0x30] sm:$0xff]  ;;  %v209_v6 = vld [vmem:[%s195_s16 + $0x8] sm:$0xff]  ;;  %v208_v7 = vld [vmem:[%s195_s16] sm:$0xff] }
  0x12   : > { %212 = vst.msk [vmem:[#allocation2 + $0x8] sm:$0xff] %vm210_vm0, %v209_v6  ;;  %v255_v16 = vld [vmem:[%s185_s23] sm:$0xff]  ;;  %v256_v17 = vld [vmem:[%s185_s23 + $0x8] sm:$0xff] }
  0x13   : > { %211 = vst.msk [vmem:[#allocation2] sm:$0xff] %vm210_vm0, %v208_v7 }
  0x18   : > { %234 = vrot.lane.b32.xlu0 %v442_v3, %s515_s18  ;;  %248 = vrot.lane.b32.xlu1 %v444_v4, %s516_s19 }
  0x19   : > { %246 = vrot.lane.b32.xlu2 %v443_v5, %s516_s19 }
  0x6b   : > { %v233_v8 = vpop.permute.xlu2 %232 }
  0x73   : > { %v247_v11 = vpop.permute.xlu2 %246 }
  0x82   : > { %v221_v9 = vpop.permute.xlu0 %220  ;;  %v219_v10 = vpop.permute.xlu1 %218 }
  0x83   : > { %226 = vst.msk [vmem:[#allocation2 + $0x8] sm:$0xff] %vm224_vm1, %v221_v9 }
  0x84   : > { %225 = vst.msk [vmem:[#allocation2] sm:$0xff] %vm224_vm1, %v219_v10 }
  0x85   : > { %239 = vst.msk [vmem:[#allocation2] sm:$0xff] %vm238_vm2, %v233_v8 }
  0x86   : > { %253 = vst.msk [vmem:[#allocation2] sm:$0xff] %vm252_vm3, %v247_v11 }
  0x8a   : > { %v235_v12 = vpop.permute.xlu0 %234  ;;  %v249_v13 = vpop.permute.xlu1 %248 }
  0x8b   : > { %240 = vst.msk [vmem:[#allocation2 + $0x8] sm:$0xff] %vm238_vm2, %v235_v12 }
  0x8c   : > { %254 = vst.msk [vmem:[#allocation2 + $0x8] sm:$0xff] %vm252_vm3, %v249_v13 }
  0x8d   : > { %v257_v15 = vld [vmem:[#allocation2] sm:$0xff] }
  0x93   : > { %v258_v14 = vld [vmem:[#allocation2 + $0x8] sm:$0xff] }
  0x94   : > { %280 = vmatpush.msra.mxu0 %v258_v14  ;;  %458 = vmatpush.msra.mxu1 %v258_v14 }
  0x96   : > { %281 = vmatpush.msra.mxu0 %v257_v15  ;;  %459 = vmatpush.msra.mxu1 %v257_v15 }
  0x97   : > { %445 = vmatmul.msk.f32.vlgmr.msra.gmra.mxu0 %vm259_vm4, %v255_v16  ;;  %446 = vmatmul.msk.f32.vlgmr.msra.gmra.mxu1 %vm259_vm4, %v256_v17 }
 0x114   : > { %v283_v18 = vpop.f32.mrf.mxu0  ;;  %v286_v19 = vpop.f32.mrf.mxu1 }
 0x115   : > { %289 = vst.msk [vmem:[%s206_s26] sm:$0xff] %vm210_vm0, %v283_v18  ;;  %295 = vrot.lane.b32.xlu1 %v286_v19, %s517_s27  ;;  %302 = vrot.lane.b32.xlu2 %v283_v18, %s518_s28 }
 0x116   : > { %290 = vst.msk [vmem:[%s206_s26 + $0x8] sm:$0xff] %vm210_vm0, %v286_v19  ;;  %293 = vrot.lane.b32.xlu0 %v283_v18, %s517_s27 }
 0x11d   : > { %311 = vrot.lane.b32.xlu1 %v283_v18, %s519_s29  ;;  %313 = vrot.lane.b32.xlu2 %v286_v19, %s519_s29 }
 0x11e   : > { %304 = vrot.lane.b32.xlu0 %v286_v19, %s518_s28 }
 0x16f   : > { %v303_v20 = vpop.permute.xlu2 %302 }
 0x170   : > { %449 = vst.msk [vmem:[%s206_s26 + $0x20] sm:$0xff] %vm210_vm0, %v303_v20 }
 0x177   : > { %v314_v21 = vpop.permute.xlu2 %313 }
 0x178   : > { %452 = vst.msk [vmem:[%s206_s26 + $0x38] sm:$0xff] %vm210_vm0, %v314_v21 }
 0x187   : > { %v296_v22 = vpop.permute.xlu1 %295 }
 0x188   : > { %448 = vst.msk [vmem:[%s206_s26 + $0x18] sm:$0xff] %vm210_vm0, %v296_v22  ;;  %v294_v23 = vpop.permute.xlu0 %293 }
 0x189   : > { %447 = vst.msk [vmem:[%s206_s26 + $0x10] sm:$0xff] %vm210_vm0, %v294_v23 }
 0x18f   : > { %v312_v24 = vpop.permute.xlu1 %311 }
 0x190   : > { %451 = vst.msk [vmem:[%s206_s26 + $0x30] sm:$0xff] %vm210_vm0, %v312_v24  ;;  %v305_v25 = vpop.permute.xlu0 %304 }
 0x191   : > { %450 = vst.msk [vmem:[%s206_s26 + $0x28] sm:$0xff] %vm210_vm0, %v305_v25 }
 0x192 PF: > { %s12_s11 = sadd.s32 1, %s512_s11   ;;  %s592_s9 = smov %s508_s10 }
 0x193   : > { %p9_p5 = scmp.ge.s32.totalorder %s12_s11, 4   ;;  %s593_s10 = smov %s595_s12 }
 0x195   :  { %11 = sbr.rel (!%p9_p5) target bundleno = 2 (0x2), region = 67 }

</bundles_post_ra>
